<compile_context>
chip_gen: v6e
topology: v6e:2x2x1
jax: 0.10.0
libtpu: 0.0.40
codegen_flags: <defaults>
</compile_context>

<pallas_src>
import functools

import numpy as np
import jax
import jax.numpy as jnp
from jax.experimental import pallas as pl
from jax.experimental.pallas import tpu as pltpu


# -----------------------------------------------------------------------------
# Weights (identical to the PyTorch module) and their exact separable form.
# -----------------------------------------------------------------------------
def _make_weights(sigma: int = 0):
    """Full 3x3x3 weights + bias, identical to the PyTorch module's __init__."""
    kernel = np.asarray(
        [[[1, 2, 1], [2, 4, 2], [1, 2, 1]],
         [[2, 4, 2], [4, 8, 4], [2, 4, 2]],
         [[1, 2, 1], [2, 4, 2], [1, 2, 1]]], dtype=np.float64)
    distance = np.zeros((3, 3, 3))
    for i in range(3):
        for j in range(3):
            for k in range(3):
                distance[i, j, k] = (i - 1) ** 2 + (j - 1) ** 2 + (k - 1) ** 2 - 1
    kernel0 = kernel * np.exp(-distance * sigma)
    w = (kernel0 / kernel0.sum()).astype(np.float32)      # (3, 3, 3)
    b = np.zeros((1,), np.float32)                        # zero bias
    return w, b


def _separable_taps(sigma: int = 0):
    """The normalized 3x3x3 kernel factors exactly as outer(v, v, v):
       v = [1,2,1] * exp(-[1,0,1]*sigma), normalized (the exp(+sigma) from the
       '-1' in distance cancels under normalization)."""
    v = np.array([1.0, 2.0, 1.0]) * np.exp(-np.array([1.0, 0.0, 1.0]) * float(sigma))
    v = v / v.sum()
    return float(v[0]), float(v[1]), float(v[2])


def _band_matrix(n, taps):
    """(n, n) matrix of the 1-D 3-tap filter with replicate padding folded into
    the first/last rows:  (B @ x)[i] = t0*x[clamp(i-1)] + t1*x[i] + t2*x[clamp(i+1)]."""
    t0, t1, t2 = taps
    m = np.zeros((n, n), np.float64)
    for i in range(n):
        m[i, max(i - 1, 0)] += t0
        m[i, i] += t1
        m[i, min(i + 1, n - 1)] += t2
    return m


# -----------------------------------------------------------------------------
# Kernel: one (TD, H*W) depth tile per grid step, lane-dense last axis.
# -----------------------------------------------------------------------------
def _conv_kernel(x_ref, up_ref, dn_ref, aux_ref, o_ref, *, taps, H, W, TD, use_mxu):
    # x_ref:   (TD, HW)  f32 — lane-dense depth tile of one batch element
    # up_ref:  (1, HW)   f32 — replicate-clamped row just above the tile
    # dn_ref:  (1, HW)   f32 — replicate-clamped row just below the tile
    # aux_ref: (HW, HW)  f32 banded-kron matrix  (MXU path)
    #          (2, HW)   f32 w==0 / w==W-1 masks (shift path)
    # o_ref:   (TD, HW)  f32
    t0, t1, t2 = taps
    HW = H * W

    x = x_ref[...]
    up = up_ref[...]
    dn = dn_ref[...]

    # ---- depth pass: 3-tap along D via sublane shifts; halo rows carry the
    #      neighbouring (or replicate-clamped) global rows, so no masking needed.
    if TD == 1:
        xm, xp = up, dn
    else:
        xm = jnp.concatenate([up, x[:TD - 1, :]], axis=0)      # x[d-1]
        xp = jnp.concatenate([x[1:, :], dn], axis=0)           # x[d+1]
    t = t0 * xm + t1 * x + t2 * xp                             # (TD, HW)

    if use_mxu:
        # ---- H & W passes fused into one banded-kron matmul on the (idle) MXU.
        #      Replicate padding is folded into the matrix; store is lane-dense.
        o_ref[...] = jnp.dot(t, aux_ref[...], preferred_element_type=jnp.float32)
    else:
        # ---- H pass: shift by +-W inside the flattened lane axis (XLU shifts).
        #      Rows with h==0 / h==H-1 keep their own values (replicate), which is
        #      exactly what these concatenations produce — no mask needed.
        hm = jnp.concatenate([t[:, :W], t[:, :HW - W]], axis=1)      # t[.., q-W]
        hp = jnp.concatenate([t[:, W:], t[:, HW - W:]], axis=1)      # t[.., q+W]
        t = t0 * hm + t1 * t + t2 * hp
        # ---- W pass: shift by +-1; fix the w==0 / w==W-1 columns (replicate).
        w_lo = aux_ref[0:1, :] > 0.5                                 # (1, HW)
        w_hi = aux_ref[1:2, :] > 0.5                                 # (1, HW)
        wm = jnp.where(w_lo, t, jnp.concatenate([t[:, :1], t[:, :HW - 1]], axis=1))
        wp = jnp.where(w_hi, t, jnp.concatenate([t[:, 1:], t[:, HW - 1:]], axis=1))
        o_ref[...] = t0 * wm + t1 * t + t2 * wp


# -----------------------------------------------------------------------------
# Wrapper
# -----------------------------------------------------------------------------
def _vmem_capacity_bytes():
    """Generation-aware VMEM capacity (v5e/v6e 128 MiB, v7x 64 MiB per TC)."""
    try:
        info = pltpu.get_tpu_info()
        cap = getattr(info, "vmem_capacity_bytes", None)
        if cap:
            return int(cap)
    except Exception:
        pass
    return 64 * 1024 * 1024   # conservative fallback (v7x per-TensorCore size)


def _pick_d_tile(D, HW, budget_bytes):
    """Largest whole-D or multiple-of-8 divisor tile fitting the VMEM budget."""
    if D * HW * 4 <= budget_bytes:
        return D
    best = None
    for t in range(8, D, 8):
        if D % t == 0 and t * HW * 4 <= budget_bytes:
            best = t
    if best is not None:
        return best
    # TODO(synk): ragged / non-divisor D tiling (manual halo DMA) for depths with
    # no suitable multiple-of-8 divisor.
    return D


def gradient_conv(x, sigma: int = 0, *, d_tile=None, use_mxu=None):
    """x: (N, 1, D, H, W) -> (N, 1, D, H, W) float32 (same semantics as torch module)."""
    N, C, D, H, W = x.shape
    assert C == 1, "GradientConv expects a single input channel"
    HW = H * W
    taps = _separable_taps(sigma)

    # MXU path: fuse H- and W-axis 3-taps into one (HW, HW) banded-kron matrix
    # (only while that matrix stays small); otherwise use the shift/mask path.
    if use_mxu is None:
        use_mxu = HW * HW * 4 <= 4 * 1024 * 1024
    if use_mxu:
        a_h = _band_matrix(H, taps)
        a_w = _band_matrix(W, taps)
        # t @ aux  ==  A_H @ t2d @ A_W^T  on the flattened (H*W) axis.
        aux = np.kron(a_h.T, a_w.T).astype(np.float32)                # (HW, HW)
    else:
        w_idx = np.arange(HW) % W
        aux = np.stack([(w_idx == 0), (w_idx == W - 1)]).astype(np.float32)  # (2, HW)
    aux_bytes = int(aux.size) * 4

    # Generation-aware VMEM budget and D tile selection.
    vmem_cap = _vmem_capacity_bytes()
    headroom = 8 * 1024 * 1024
    block_budget = max((vmem_cap - headroom - 2 * aux_bytes) // 5, 1 * 1024 * 1024)
    TD = d_tile if d_tile is not None else _pick_d_tile(D, HW, block_budget)
    if D % TD != 0 or (TD != D and TD % 8 != 0):
        raise ValueError(f"d_tile={TD} must divide D={D} and be a multiple of 8 (or == D)")
    nt = D // TD

    vmem_limit = int(min(
        max(4 * TD * HW * 4 + 2 * aux_bytes + (4 << 20), 32 << 20),
        max(vmem_cap - headroom, 32 << 20)))

    # Lane-dense working layout: collapse (H, W) -> HW on the last axis.  This is
    # a metadata-only reshape of trailing dims in HBM (no copy) and makes every
    # in-kernel load/store >=128-lane dense even when W < 128.
    x_flat = x.astype(jnp.float32).reshape(N, 1, D, HW)

    # One replicate-clamped halo row above/below each D tile (tiny gather).
    up_idx = np.maximum(np.arange(nt) * TD - 1, 0)
    dn_idx = np.minimum(np.arange(nt) * TD + TD, D - 1)
    x_up = x_flat[:, 0, up_idx, :][:, :, None, :]                     # (N, nt, 1, HW)
    x_dn = x_flat[:, 0, dn_idx, :][:, :, None, :]                     # (N, nt, 1, HW)

    kernel = functools.partial(_conv_kernel, taps=taps, H=H, W=W, TD=TD, use_mxu=use_mxu)

    out = pl.pallas_call(
        kernel,
        out_shape=jax.ShapeDtypeStruct((N, 1, D, HW), jnp.float32),
        grid_spec=pltpu.PrefetchScalarGridSpec(
            num_scalar_prefetch=0,
            grid=(N, nt),
            in_specs=[
                pl.BlockSpec((None, None, TD, HW), lambda n, dt: (n, 0, dt, 0)),   # x tile
                pl.BlockSpec((None, None, 1, HW), lambda n, dt: (n, dt, 0, 0)),    # halo up
                pl.BlockSpec((None, None, 1, HW), lambda n, dt: (n, dt, 0, 0)),    # halo down
                pl.BlockSpec(tuple(aux.shape), lambda n, dt: (0, 0)),              # M / masks
            ],
            out_specs=pl.BlockSpec((None, None, TD, HW), lambda n, dt: (n, 0, dt, 0)),
        ),
        compiler_params=pltpu.CompilerParams(
            dimension_semantics=("parallel", "parallel"),
            vmem_limit_bytes=vmem_limit),
    )(x_flat, x_up, x_dn, jnp.asarray(aux))

    return out.reshape(N, 1, D, H, W)


# -----------------------------------------------------------------------------
# Pure-JAX reference: exact analog of the PyTorch module.
# -----------------------------------------------------------------------------
def _reference(x, sigma: int = 0):
    w, b = _make_weights(sigma)
    N, C, D, H, W = x.shape
    xp = jnp.pad(x[:, 0].astype(jnp.float32),
                 ((0, 0), (1, 1), (1, 1), (1, 1)), mode="edge")
    acc = jnp.zeros((N, D, H, W), jnp.float32)
    for kd in range(3):
        for kh in range(3):
            for kw in range(3):
                acc = acc + w[kd, kh, kw] * xp[:, kd:kd + D, kh:kh + H, kw:kw + W]
    return (acc + b[0])[:, None]


if __name__ == "__main__":
    key = jax.random.PRNGKey(0)
    k1, k2 = jax.random.split(key)

    def _check(y, y_ref, tol):
        np.testing.assert_allclose(np.asarray(y), np.asarray(y_ref), rtol=tol, atol=tol)

    # Main shapes: MXU in-slice path, single D tile.  (MXU f32 matmul may use
    # reduced-precision passes, hence the looser tolerance on that path.)
    x = jax.random.normal(k1, (2, 1, 8, 16, 16), dtype=jnp.float32)
    for sigma in (0, 1):
        y = jax.block_until_ready(gradient_conv(x, sigma=sigma))
        _check(y, _reference(x, sigma=sigma), 2e-3)

    # Exercise the D-tiled (halo) path and the shift/mask (non-MXU) path.
    x2 = jax.random.normal(k2, (1, 1, 16, 16, 16), dtype=jnp.float32)
    y = jax.block_until_ready(gradient_conv(x2, sigma=1, d_tile=8))                   # 2 tiles, MXU
    _check(y, _reference(x2, sigma=1), 2e-3)
    y = jax.block_until_ready(gradient_conv(x2, sigma=1, d_tile=8, use_mxu=False))    # 2 tiles, shifts
    _check(y, _reference(x2, sigma=1), 1e-5)
    y = jax.block_until_ready(gradient_conv(x2, sigma=0, use_mxu=False))              # 1 tile, shifts
    _check(y, _reference(x2, sigma=0), 1e-5)

    print("KERNEL_OK")
</pallas_src>

<mosaic_0001>
module attributes {stable_mosaic.version = 11 : i64} {
  func.func @_conv_kernel(%arg0: i32, %arg1: i32, %arg2: memref<1x1x8x256xf32, #tpu.memory_space<vmem>>, %arg3: memref<1x1x1x256xf32, #tpu.memory_space<vmem>>, %arg4: memref<1x1x1x256xf32, #tpu.memory_space<vmem>>, %arg5: memref<256x256xf32, #tpu.memory_space<vmem>>, %arg6: memref<1x1x8x256xf32, #tpu.memory_space<vmem>>) attributes {dimension_semantics = [#tpu.dimension_semantics<parallel>, #tpu.dimension_semantics<parallel>], iteration_bounds = array<i64: 2, 1>, scalar_prefetch = 0 : i64, scratch_operands = 0 : i64, tpu.core_type = #tpu.core_type<tc>, window_params = [{transform_indices = @transform_0, window_bounds = array<i64: 1, 1, 8, 256>}, {transform_indices = @transform_1, window_bounds = array<i64: 1, 1, 1, 256>}, {transform_indices = @transform_2, window_bounds = array<i64: 1, 1, 1, 256>}, {pipeline_mode = #tpu.pipeline_mode<synchronous>, transform_indices = @transform_3, window_bounds = array<i64: 256, 256>}, {transform_indices = @transform_4, window_bounds = array<i64: 1, 1, 8, 256>}]} {
    %c0 = arith.constant 0 : index
    %c0_0 = arith.constant 0 : index
    %c0_1 = arith.constant 0 : index
    %c0_2 = arith.constant 0 : index
    %0 = vector.load %arg2[%c0, %c0_0, %c0_1, %c0_2] : memref<1x1x8x256xf32, #tpu.memory_space<vmem>>, vector<1x1x8x256xf32>
    %1 = vector.shape_cast %0 : vector<1x1x8x256xf32> to vector<8x256xf32>
    %c0_3 = arith.constant 0 : index
    %c0_4 = arith.constant 0 : index
    %c0_5 = arith.constant 0 : index
    %c0_6 = arith.constant 0 : index
    %2 = vector.load %arg3[%c0_3, %c0_4, %c0_5, %c0_6] : memref<1x1x1x256xf32, #tpu.memory_space<vmem>>, vector<1x1x1x256xf32>
    %3 = vector.shape_cast %2 : vector<1x1x1x256xf32> to vector<1x256xf32>
    %c0_7 = arith.constant 0 : index
    %c0_8 = arith.constant 0 : index
    %c0_9 = arith.constant 0 : index
    %c0_10 = arith.constant 0 : index
    %4 = vector.load %arg4[%c0_7, %c0_8, %c0_9, %c0_10] : memref<1x1x1x256xf32, #tpu.memory_space<vmem>>, vector<1x1x1x256xf32>
    %5 = vector.shape_cast %4 : vector<1x1x1x256xf32> to vector<1x256xf32>
    %6 = vector.extract_strided_slice %1 {offsets = [0, 0], sizes = [7, 256], strides = [1, 1]} : vector<8x256xf32> to vector<7x256xf32>
    %7 = tpu.concatenate %3, %6 in 0 : vector<1x256xf32>, vector<7x256xf32> -> vector<8x256xf32>
    %8 = vector.extract_strided_slice %1 {offsets = [1, 0], sizes = [7, 256], strides = [1, 1]} : vector<8x256xf32> to vector<7x256xf32>
    %9 = tpu.concatenate %8, %5 in 0 : vector<7x256xf32>, vector<1x256xf32> -> vector<8x256xf32>
    %cst = arith.constant 2.500000e-01 : f32
    %10 = vector.broadcast %cst : f32 to vector<8x256xf32>
    %11 = arith.mulf %10, %7 : vector<8x256xf32>
    %cst_11 = arith.constant 5.000000e-01 : f32
    %12 = vector.broadcast %cst_11 : f32 to vector<8x256xf32>
    %13 = arith.mulf %12, %1 : vector<8x256xf32>
    %14 = arith.addf %11, %13 : vector<8x256xf32>
    %cst_12 = arith.constant 2.500000e-01 : f32
    %15 = vector.broadcast %cst_12 : f32 to vector<8x256xf32>
    %16 = arith.mulf %15, %9 : vector<8x256xf32>
    %17 = arith.addf %14, %16 : vector<8x256xf32>
    %c0_13 = arith.constant 0 : index
    %c0_14 = arith.constant 0 : index
    %18 = vector.load %arg5[%c0_13, %c0_14] : memref<256x256xf32, #tpu.memory_space<vmem>>, vector<256x256xf32>
    %cst_15 = arith.constant dense<0.000000e+00> : vector<8x256xf32>
    %19 = tpu.matmul %17, %18, %cst_15 {dimension_numbers = #tpu.dot_dimension_numbers<[1], [0], [0], [1], [0, 0, 1, 1], [], []>} : vector<8x256xf32>, vector<256x256xf32>, vector<8x256xf32> -> vector<8x256xf32>
    %c0_16 = arith.constant 0 : index
    %c0_17 = arith.constant 0 : index
    %c0_18 = arith.constant 0 : index
    %c0_19 = arith.constant 0 : index
    %20 = vector.load %arg6[%c0_16, %c0_17, %c0_18, %c0_19] : memref<1x1x8x256xf32, #tpu.memory_space<vmem>>, vector<1x1x8x256xf32>
    %21 = vector.shape_cast %20 : vector<1x1x8x256xf32> to vector<8x256xf32>
    %22 = vector.shape_cast %19 : vector<8x256xf32> to vector<1x1x8x256xf32>
    tpu.vector_store %arg6[%c0_16, %c0_17, %c0_18, %c0_19], %22 {strides = array<i32>} : memref<1x1x8x256xf32, #tpu.memory_space<vmem>>, vector<1x1x8x256xf32>,
    return
  }
  func.func @transform_0(%arg0: i32, %arg1: i32) -> (i32, i32, i32, i32) {
    %c0_i32 = arith.constant 0 : i32
    %c0_i32_0 = arith.constant 0 : i32
    %c0_i32_1 = arith.constant 0 : i32
    return %arg0, %c0_i32, %arg1, %c0_i32_0 : i32, i32, i32, i32
  }
  func.func @transform_1(%arg0: i32, %arg1: i32) -> (i32, i32, i32, i32) {
    %c0_i32 = arith.constant 0 : i32
    %c0_i32_0 = arith.constant 0 : i32
    %c0_i32_1 = arith.constant 0 : i32
    return %arg0, %arg1, %c0_i32, %c0_i32_0 : i32, i32, i32, i32
  }
  func.func @transform_2(%arg0: i32, %arg1: i32) -> (i32, i32, i32, i32) {
    %c0_i32 = arith.constant 0 : i32
    %c0_i32_0 = arith.constant 0 : i32
    %c0_i32_1 = arith.constant 0 : i32
    return %arg0, %arg1, %c0_i32, %c0_i32_0 : i32, i32, i32, i32
  }
  func.func @transform_3(%arg0: i32, %arg1: i32) -> (i32, i32) {
    %c0_i32 = arith.constant 0 : i32
    %c0_i32_0 = arith.constant 0 : i32
    %c0_i32_1 = arith.constant 0 : i32
    return %c0_i32, %c0_i32_0 : i32, i32
  }
  func.func @transform_4(%arg0: i32, %arg1: i32) -> (i32, i32, i32, i32) {
    %c0_i32 = arith.constant 0 : i32
    %c0_i32_0 = arith.constant 0 : i32
    %c0_i32_1 = arith.constant 0 : i32
    return %arg0, %c0_i32, %arg1, %c0_i32_0 : i32, i32, i32, i32
  }
}

</mosaic_0001>

<bundles_post_ra>
// kernel: tpu_custom_call.1
= control target key start
LH: loop header
LB: loop body
LE: loop exit
PB: predicated region body
PF: predicated region fallthrough
CT: control target
= control target key end

     0   :  { %s1266_s0 = inlined_call_operand.hbm [shape: f32[2,1,8,256], index: 0, kind: input, shape index: {}]   ;;  %s1267_s1 = inlined_call_operand.hbm [shape: f32[2,1,1,256], index: 1, kind: input, shape index: {}]   ;;  %s1268_s2 = inlined_call_operand.hbm [shape: f32[2,1,1,256], index: 2, kind: input, shape index: {}]   ;;  %s1269_s3 = inlined_call_operand.hbm [shape: f32[256,256], index: 3, kind: input, shape index: {}]   ;;  %s1270_s4 = inlined_call_operand.hbm [shape: f32[2,1,8,256], index: 4, kind: output, shape index: {}]  }
   0x1   :  { %1277 = sst [smem:[#allocation19_spill]] %s1266_s0 }
   0x2   :  { %1278 = sst [smem:[#allocation20_spill]] %s1267_s1 }
   0x3   :  { %1279 = sst [smem:[#allocation21_spill]] %s1268_s2 }
   0x4   :  { %9 = vsyncpa [#allocation3], 0 }
   0x5   :  { %11 = vsyncpa [#allocation3 + $0x1], 0 }
   0x6   :  { %12 = vsyncpa [#allocation6], 0 }
   0x7   :  { %14 = vsyncpa [#allocation6 + $0x1], 0 }
   0x8   :  { %15 = vsyncpa [#allocation9], 0 }
   0x9   :  { %16 = vsyncpa [#allocation4], 0 }
   0xa   :  { %18 = vsyncpa [#allocation4 + $0x1], 0  ;;  %s1023_s15 = smov 0   ;;  %s1025_s16 = smov 0  }
   0xb   :  { %s1027_s17 = smov 0   ;;  %s1029_s18 = smov 0  }
   0xc   :  { %s1031_s19 = smov 0   ;;  %s1033_s20 = smov 0  }
   0xd LB: > { %1280 = sst [smem:[#allocation15_spill]] %s977_s17  ;;  %s36_s21 = sadd.s32 1, %s985_s19  ;;  %s989_s20 = sphi %s1033_s20, %s24_s20   ;;  %s985_s19 = sphi %s1031_s19, %s1303_s19   ;;  %s981_s18 = sphi %s1029_s18, %s1302_s18   ;;  %s977_s17 = sphi %s1027_s17, %s1301_s17   ;;  %s973_s16 = sphi %s1025_s16, %s1305_s16   ;;  %s969_s15 = sphi %s1023_s15, %s1304_s15  }
   0xe   : > { %1281 = sst [smem:[#allocation16_spill]] %s985_s19  ;;  %s45_s22 = sadd.s32 1, %s977_s17 }
   0xf   : > { %p38_p0 = scmp.ge.s32.totalorder %s36_s21, 2  ;;  %p52_p1 = scmp.ne.s32.totalorder %s977_s17, %s973_s16 }
  0x10   : > { %p53_p2 = scmp.eq.s32.totalorder %s989_s20, 0  ;;  %p737_p5 = scmp.lt.s32.totalorder %s989_s20, 2 }
  0x11   : > { %s1307_s21 = smov (%p38_p0, %s36_s21), 0  ;;  %s1068_s24 = sand.u32 1, %s977_s17  }
  0x12   : > { %1282 = sst [smem:[#allocation17_spill]] %s1307_s21  ;;  %p54_p4 = por %p53_p2, %p52_p1 }
  0x13   : > { %s40_s23 = ssub.s32 %s985_s19, %s1307_s21  ;;  %s221_s26 = sand.u32 1, %s989_s20  }
  0x14   : > { %p43_p6 = scmp.eq.s32.totalorder %s40_s23, 0  ;;  %p1070_p7 = pnand %p737_p5, %p54_p4 }
  0x15   : > { %s1271_s27 = sshll.u32 %s1068_s24, 1  ;;  %s703_s29 = sshll.u32 %s985_s19, 5 }
  0x16   : > { %s1077_s28 = scalar_select %p43_p6, %s977_s17, %s45_s22  }
  0x17   : > { %s1285_s1 = sld [smem:[#allocation20_spill]]  ;;  %s225_s7 = scalar_lea.vmem [#allocation5], %s1271_s27 }
  0x18   : > { %1284 = sst [smem:[#allocation18_spill]] %s1077_s28  ;;  %s235_s8 = sshll.u32 %s225_s7, 4  ;;  %s236_s8 = int_to_ptr.vmem [resolvable:$true] %s235_s8 }
  0x19   : > { %s1085_s9 = scalar_lea.sflag [#allocation6], %s221_s26  ;;  %p1273_p8 = pneg %p1070_p7 }
  0x1a   : > { %s804_s10 = scalar_lea.vmem %s236_s8, 32  ;;  %s991_s11 = smov [#allocation5]  }
  0x1b   : > { %p805_p9 = scmp.ne.s32.totalorder %s236_s8, %s804_s10  ;;  %s809_s12 = sshll.u32 %s991_s11, 4  ;;  %s810_s12 = int_to_ptr.vmem [resolvable:$false] %s809_s12 }
  0x1c   : > { %s811_s13 = scalar_lea.vmem %s810_s12, 64  ;;  %p812_p12 = scmp.lt.s32.totalorder %s236_s8, %s810_s12 }
  0x1d   : > { %s233_s6 = scalar_lea.hbm %s1285_s1, %s703_s29  ;;  %p807_p10 = pnand %p805_p9, %p1273_p8 }
  0x1e   : > { %p813_p13 = scmp.lt.s32.totalorder %s811_s13, %s804_s10 }
  0x1f   : > { %p808_p11 = pneg %p807_p10 }
  0x20   : > { %p814_p0 = por %p813_p13, %p812_p12 }
  0x22   : > { %p815_p2 = pnand %p814_p0, %p808_p11 }
  0x24   : > { %818 = shalt.err (!%p815_p2)
}
  0x25   : > { %728 = dma.hbm_to_vmem [thread:$0]  (!%p1070_p7), %s233_s6, 32, %s236_s8, %s1085_s9  }
  0x26   : > { %s1286_s2 = sld [smem:[#allocation21_spill]]  ;;  %s1101_s26 = sadd.s32 4294967295, %s989_s20  }
  0x27   : > { %s678_s30 = sadd.s32 4294967294, %s989_s20   ;;  %p58_p4 = scmp.ne.s32.totalorder %s973_s16, %s969_s15 }
  0x28   : > { %p1272_p5 = scmp.eq.s32.totalorder %s1101_s26, 0  ;;  %p161_p6 = scmp.eq.s32.totalorder %s1101_s26, 1 }
  0x29   : > { %p167_p9 = scmp.eq.s32.totalorder %s678_s30, 1  ;;  %p679_p10 = scmp.ge.s32.totalorder %s989_s20, 1 }
  0x2a   : > { %p1111_p11 = por %p1272_p5, %p58_p4  ;;  %p1118_p12 = por %p161_p6, %p52_p1 }
  0x2b   : > { %p1122_p13 = por %p167_p9, %p58_p4  ;;  %p174_p0 = scmp.lt.s32.totalorder %s989_s20, 3 }
  0x2c   : > { %s1098_s23 = scalar_lea.hbm %s1286_s2, %s703_s29  ;;  %s992_s8 = smov [#allocation8]  }
  0x2d   : > { %s1289_s6 = scalar_select %p1122_p13, 1, 0 }
  0x2e   : > { %p1127_p2 = pnand %p679_p10, %p174_p0  ;;  %s186_s10 = sshll.u32 %s992_s8, 4  ;;  %s187_s10 = int_to_ptr.vmem [resolvable:$true] %s186_s10 }
  0x2f   : > { %s682_s11 = sshll.u32 %s1068_s24, 4  ;;  %s702_s13 = sshll.u32 %s985_s19, 8 }
  0x30   : > { %p718_p3 = pneg %p1127_p2  ;;  %s204_s14 = scalar_lea.vmem [#allocation2], %s682_s11 }
  0x31   : > { %s214_s22 = sshll.u32 %s204_s14, 4  ;;  %s1292_s0 = sld [smem:[#allocation19_spill]]  ;;  %s215_s22 = int_to_ptr.vmem [resolvable:$true] %s214_s22 }
  0x32   : > { %p1136_p1 = pnand %p718_p3, %p1272_p5  ;;  %s830_s8 = scalar_lea.vmem %s187_s10, 8192 }
  0x33   : > { %p831_p6 = scmp.ne.s32.totalorder %s187_s10, %s830_s8  ;;  %p838_p0 = scmp.lt.s32.totalorder %s187_s10, %s187_s10 }
  0x34   : > { %p821_p4 = pneg %p1136_p1  ;;  %p839_p3 = scmp.lt.s32.totalorder %s830_s8, %s830_s8 }
  0x36   : > { %p833_p9 = pnand %p831_p6, %p821_p4  ;;  %p840_p5 = por %p839_p3, %p838_p0 }
  0x37   : > { %s1144_s1 = scalar_lea.hbm %s1292_s0, %s702_s13 }
  0x38   : > { %p834_p10 = pneg %p833_p9 }
  0x3a   : > { %p841_p8 = pnand %p840_p5, %p834_p10 }
  0x3c   : > { %844 = shalt.err (!%p841_p8)
}
  0x3d   : > { %s993_s2 = smov 256   ;;  %s994_s11 = smov 16  }
  0x3e   : > { %721 = dma.hbm_to_vmem [thread:$0]  (!%p1136_p1), %s1269_s3, 8192, %s187_s10, [#allocation9], %s993_s2, %s993_s2, %s994_s11  }
  0x3f   : > { %s1293_s14 = sshll.u32 %s1068_s24, 1  ;;  %s201_s21 = scalar_lea.sflag [#allocation3], %s1068_s24 }
  0x40   : > { %s246_s30 = scalar_lea.vmem [#allocation7], %s1293_s14  ;;  %s858_s8 = scalar_lea.vmem %s215_s22, 256 }
  0x41   : > { %s256_s0 = sshll.u32 %s246_s30, 4  ;;  %p859_p4 = scmp.ne.s32.totalorder %s215_s22, %s858_s8  ;;  %s257_s0 = int_to_ptr.vmem [resolvable:$true] %s256_s0 }
  0x42   : > { %p1294_p8 = pneg %p1070_p7  ;;  %s995_s19 = smov [#allocation2]  }
  0x43   : > { %s863_s28 = sshll.u32 %s995_s19, 4  ;;  %s864_s28 = int_to_ptr.vmem [resolvable:$false] %s863_s28 }
  0x44   : > { %p861_p5 = pnand %p859_p4, %p1294_p8  ;;  %s865_s17 = scalar_lea.vmem %s864_s28, 512 }
  0x45   : > { %p866_p9 = scmp.lt.s32.totalorder %s215_s22, %s864_s28  ;;  %p867_p10 = scmp.lt.s32.totalorder %s865_s17, %s858_s8 }
  0x46   : > { %p862_p6 = pneg %p861_p5 }
  0x47   : > { %p868_p0 = por %p867_p10, %p866_p9 }
  0x49   : > { %p869_p3 = pnand %p868_p0, %p862_p6 }
  0x4b   : > { %872 = shalt.err (!%p869_p3)
}
  0x4c   : > { %725 = dma.hbm_to_vmem [thread:$0]  (!%p1070_p7), %s1144_s1, 256, %s215_s22, %s201_s21  }
  0x4d   : > { %s886_s2 = scalar_lea.vmem %s257_s0, 32  ;;  %p1295_p4 = pmov %p1294_p8 }
  0x4e   : > { %p887_p1 = scmp.ne.s32.totalorder %s257_s0, %s886_s2  ;;  %s996_s19 = smov [#allocation7]  }
  0x4f   : > { %s891_s24 = sshll.u32 %s996_s19, 4  ;;  %s892_s24 = int_to_ptr.vmem [resolvable:$false] %s891_s24 }
  0x50   : > { %p889_p8 = pnand %p887_p1, %p1295_p4  ;;  %s893_s28 = scalar_lea.vmem %s892_s24, 64 }
  0x51   : > { %p894_p13 = scmp.lt.s32.totalorder %s257_s0, %s892_s24  ;;  %p895_p9 = scmp.lt.s32.totalorder %s893_s28, %s886_s2 }
  0x52   : > { %p890_p5 = pneg %p889_p8 }
  0x53   : > { %p896_p6 = por %p895_p9, %p894_p13 }
  0x55   : > { %p897_p10 = pnand %p896_p6, %p890_p5 }
  0x57   : > { %900 = shalt.err (!%p897_p10)
}
  0x58   : > { %731 = dma.hbm_to_vmem [thread:$0]  (!%p1070_p7), %s1098_s23, 32, %s257_s0, %s1085_s9  }
  0x59   : > { %265 = sbr.rel (%p1127_p2) target bundleno = 374 (0x176), region = 36  ;;  %s1172_s1 = sand.u32 (!%p1127_p2), 1, %s973_s16  }
  0x5a   : > { %s692_s17 = sshll.u32 (!%p1127_p2), %s1172_s1, 4  ;;  %s268_s21 = scalar_lea.sflag (!%p1127_p2), [#allocation3], %s1172_s1 }
  0x5b   : > { %s1178_s10 = scalar_lea.vmem (!%p1127_p2), [#allocation2], %s692_s17 }
  0x5e   : > { %952 = dma.done.wait (%p1111_p11), %s268_s21, 256  }
  0x5f   : > { %954 = vsyncadd (%p1111_p11), %s268_s21, 4294967040  ;;  %s276_s0 = sand.u32 1, %s1101_s26   ;;  %s693_s25 = sshll.u32 %s1172_s1, 1 }
  0x60   : > { %s277_s9 = scalar_lea.sflag [#allocation6], %s276_s0  ;;  %s1186_s23 = scalar_lea.vmem [#allocation5], %s693_s25 }
  0x61   : > { %956 = dma.done.wait (%p1111_p11), %s277_s9, 64  }
  0x62   : > { %958 = vsyncadd (%p1111_p11), %s277_s9, 4294967232  ;;  %s1192_s7 = scalar_lea.vmem [#allocation7], %s693_s25  ;;  %p1296_p7 = scmp.eq.s32.totalorder %s1101_s26, 0 }
  0x64   : > { %960 = dma.done.wait (%p1296_p7), [#allocation9], 8192   ;;  %p1297_p13 = pmov %p1296_p7 }
  0x65   : > { %v411_v0 = vld [vmem:[#allocation8 + $0xf8] sm:$0xff]  ;;  %v410_v1 = vld [vmem:[#allocation8 + $0xf0] sm:$0xff]  ;;  %v409_v2 = vld [vmem:[#allocation8 + $0xe8] sm:$0xff]  ;;  %v333_v13 = vlaneseq  ;;  %vm349_vm0 = vcmask 1040384   ;;  %vm367_vm1 = vcmask 1046528   ;;  %s327_s26 = scalar_lea.vmem [#allocation10], %s692_s17 }
  0x66   : > { %962 = vsyncadd (%p1297_p13), [#allocation9], 4294959104  ;;  %444 = vmatprep.subr.mxu0 %v411_v0  ;;  %v408_v3 = vld [vmem:[#allocation8 + $0xe0] sm:$0xff]  ;;  %v407_v4 = vld [vmem:[#allocation8 + $0xd8] sm:$0xff]  ;;  %s534_s5 = sshll.u32 %s327_s26, 4  ;;  %s705_s12 = sshll.u32 %s981_s18, 8  ;;  %s1221_s5 = int_to_ptr.vmem [resolvable:$true] %s534_s5 }
  0x67   : > { %445 = vmatpush1.msra.mxu0 %v410_v1  ;;  %v406_v5 = vld [vmem:[#allocation8 + $0xd0] sm:$0xff]  ;;  %v405_v6 = vld [vmem:[#allocation8 + $0xc8] sm:$0xff]  ;;  %v404_v7 = vld [vmem:[#allocation8 + $0xc0] sm:$0xff]  ;;  %v1198_v18 = vshrl.u32 %v333_v13, 7  ;;  %s532_s27 = scalar_lea.hbm %s1270_s4, %s705_s12  ;;  %s518_s13 = scalar_lea.sflag [#allocation4], %s1172_s1 }
  0x68   : > { %446 = vmatprep.subr.mxu0 %v409_v2  ;;  %v403_v8 = vld [vmem:[#allocation8 + $0xb8] sm:$0xff]  ;;  %v402_v9 = vld [vmem:[#allocation8 + $0xb0] sm:$0xff]  ;;  %v401_v10 = vld [vmem:[#allocation8 + $0xa8] sm:$0xff]  ;;  %s901_s14 = scalar_lea.vmem %s1221_s5, 256  ;;  %s997_s18 = smov [#allocation10]  }
  0x69   : > { %447 = vmatpush1.msra.mxu0 %v408_v3  ;;  %v400_v11 = vld [vmem:[#allocation8 + $0xa0] sm:$0xff]  ;;  %v399_v12 = vld [vmem:[#allocation8 + $0x98] sm:$0xff]  ;;  %v398_v14 = vld [vmem:[#allocation8 + $0x90] sm:$0xff]  ;;  %v339_v23 = vsub.s32 1, %v1198_v18  ;;  %v335_v62 = vsub.s32 0, %v1198_v18  ;;  %p902_p11 = scmp.ne.s32.totalorder %s1221_s5, %s901_s14  ;;  %s905_s30 = sshll.u32 %s997_s18, 4  ;;  %s906_s30 = int_to_ptr.vmem [resolvable:$false] %s905_s30 }
  0x6a   : > { %448 = vmatprep.subr.mxu0 %v407_v4  ;;  %v397_v15 = vld [vmem:[#allocation8 + $0x88] sm:$0xff]  ;;  %v396_v16 = vld [vmem:[#allocation8 + $0x80] sm:$0xff]  ;;  %v395_v17 = vld [vmem:[#allocation8 + $0x78] sm:$0xff]  ;;  %s907_s8 = scalar_lea.vmem %s906_s30, 512  ;;  %p908_p3 = scmp.lt.s32.totalorder %s1221_s5, %s906_s30 }
  0x6b   : > { %449 = vmatpush1.msra.mxu0 %v406_v5  ;;  %v394_v19 = vld [vmem:[#allocation8 + $0x70] sm:$0xff]  ;;  %v393_v20 = vld [vmem:[#allocation8 + $0x68] sm:$0xff]  ;;  %v392_v21 = vld [vmem:[#allocation8 + $0x60] sm:$0xff]  ;;  %p903_p2 = pnand %p902_p11, %p1118_p12  ;;  %p909_p1 = scmp.lt.s32.totalorder %s907_s8, %s901_s14 }
  0x6c   : > { %450 = vmatprep.subr.mxu0 %v405_v6  ;;  %v391_v22 = vld [vmem:[#allocation8 + $0x58] sm:$0xff]  ;;  %v390_v24 = vld [vmem:[#allocation8 + $0x50] sm:$0xff]  ;;  %v389_v25 = vld [vmem:[#allocation8 + $0x48] sm:$0xff] }
  0x6d   : > { %451 = vmatpush1.msra.mxu0 %v404_v7  ;;  %v388_v26 = vld [vmem:[#allocation8 + $0x40] sm:$0xff]  ;;  %v1203_v28 = vld [vmem:[%s1186_s23] sm:$0x3]  ;;  %v1206_v30 = vld [vmem:[%s1192_s7] sm:$0x3]  ;;  %p904_p0 = pneg %p903_p2  ;;  %p910_p4 = por %p909_p1, %p908_p3 }
  0x6e   : > { %452 = vmatprep.subr.mxu0 %v403_v8  ;;  %v329_v27 = vld [vmem:[%s1178_s10 + $0x8] sm:$0xff]  ;;  %v387_v29 = vld [vmem:[#allocation8 + $0x38] sm:$0xff]  ;;  %v340_v31 = vrot.slane %v1203_v28, %v339_v23  ;;  %v364_v35 = vrot.slane %v1206_v30, %v339_v23  ;;  %v385_v37 = vld [vmem:[#allocation8 + $0x28] sm:$0xff]  ;;  %v336_v4 = vrot.slane %v1203_v28, %v335_v62 }
  0x6f   : > { %453 = vmatpush1.msra.mxu0 %v402_v9  ;;  %v346_v32 = vrot.slane %v329_v27, 7  ;;  %v353_v33 = vrot.slane %v329_v27, 1  ;;  %v386_v34 = vld [vmem:[#allocation8 + $0x30] sm:$0xff]  ;;  %v373_v36 = vmul.f32 0.5, %v329_v27  ;;  %v384_v39 = vld [vmem:[#allocation8 + $0x20] sm:$0xff]  ;;  %v383_v42 = vld [vmem:[#allocation8 + $0x18] sm:$0xff]  ;;  %p911_p8 = pnand %p910_p4, %p904_p0 }
  0x70   : > { %454 = vmatprep.subr.mxu0 %v401_v10  ;;  %v382_v44 = vld [vmem:[#allocation8 + $0x10] sm:$0xff]  ;;  %v381_v46 = vld [vmem:[#allocation8 + $0x8] sm:$0xff]  ;;  %v380_v47 = vld [vmem:[#allocation8] sm:$0xff]  ;;  %v360_v10 = vrot.slane %v1206_v30, %v335_v62 }
  0x71   : > { %455 = vmatpush1.msra.mxu0 %v400_v11  ;;  %v351_v38 = vsel %vm349_vm0, %v340_v31, %v346_v32  ;;  %v369_v40 = vsel %vm367_vm1, %v353_v33, %v364_v35  ;;  %v443_v49 = vld [vmem:[#allocation8 + $0x1f8] sm:$0xff]  ;;  %v442_v50 = vld [vmem:[#allocation8 + $0x1f0] sm:$0xff]  ;;  %v441_v51 = vld [vmem:[#allocation8 + $0x1e8] sm:$0xff] }
  0x72   : > { %456 = vmatprep.subr.mxu0 %v399_v12  ;;  %v371_v41 = vmul.f32 0.25, %v351_v38  ;;  %v377_v43 = vmul.f32 0.25, %v369_v40  ;;  %v440_v52 = vld [vmem:[#allocation8 + $0x1e0] sm:$0xff]  ;;  %v439_v53 = vld [vmem:[#allocation8 + $0x1d8] sm:$0xff]  ;;  %v438_v54 = vld [vmem:[#allocation8 + $0x1d0] sm:$0xff] }
  0x73   : > { %457 = vmatpush1.msra.mxu0 %v398_v14  ;;  %v437_v55 = vld [vmem:[#allocation8 + $0x1c8] sm:$0xff]  ;;  %v436_v56 = vld [vmem:[#allocation8 + $0x1c0] sm:$0xff]  ;;  %v435_v57 = vld [vmem:[#allocation8 + $0x1b8] sm:$0xff] }
  0x74   : > { %458 = vmatprep.subr.mxu0 %v397_v15  ;;  %v375_v45 = vadd.f32 %v373_v36, %v371_v41  ;;  %v434_v58 = vld [vmem:[#allocation8 + $0x1b0] sm:$0xff]  ;;  %v433_v59 = vld [vmem:[#allocation8 + $0x1a8] sm:$0xff]  ;;  %v432_v60 = vld [vmem:[#allocation8 + $0x1a0] sm:$0xff] }
  0x75   : > { %459 = vmatpush1.msra.mxu0 %v396_v16  ;;  %v431_v61 = vld [vmem:[#allocation8 + $0x198] sm:$0xff]  ;;  %v430_v63 = vld [vmem:[#allocation8 + $0x190] sm:$0xff]  ;;  %v429_v1 = vld [vmem:[#allocation8 + $0x188] sm:$0xff] }
  0x76   : > { %460 = vmatprep.subr.mxu0 %v395_v17  ;;  %v379_v48 = vadd.f32 %v377_v43, %v375_v45  ;;  %v328_v0 = vld [vmem:[%s1178_s10] sm:$0xff]  ;;  %v428_v2 = vld [vmem:[#allocation8 + $0x180] sm:$0xff]  ;;  %v426_v6 = vld [vmem:[#allocation8 + $0x170] sm:$0xff] }
  0x77   : > { %461 = vmatpush1.msra.mxu0 %v394_v19  ;;  %v427_v3 = vld [vmem:[#allocation8 + $0x178] sm:$0xff]  ;;  %v345_v5 = vrot.slane %v328_v0, 7  ;;  %v425_v7 = vld [vmem:[#allocation8 + $0x168] sm:$0xff]  ;;  %v424_v8 = vld [vmem:[#allocation8 + $0x160] sm:$0xff]  ;;  %v352_v12 = vrot.slane %v328_v0, 1  ;;  %v372_v17 = vmul.f32 0.5, %v328_v0 }
  0x78   : > { %462 = vmatprep.subr.mxu0 %v393_v20  ;;  %508 = vmatprep.mubr.f32.mxu0 %v379_v48  ;;  %v423_v9 = vld [vmem:[#allocation8 + $0x158] sm:$0xff]  ;;  %v422_v13 = vld [vmem:[#allocation8 + $0x150] sm:$0xff]  ;;  %v421_v14 = vld [vmem:[#allocation8 + $0x148] sm:$0xff] }
  0x79   : > { %463 = vmatpush1.msra.mxu0 %v392_v21  ;;  %v350_v11 = vsel %vm349_vm0, %v336_v4, %v345_v5  ;;  %v420_v15 = vld [vmem:[#allocation8 + $0x140] sm:$0xff]  ;;  %v419_v18 = vld [vmem:[#allocation8 + $0x138] sm:$0xff]  ;;  %v368_v19 = vsel %vm367_vm1, %v352_v12, %v360_v10  ;;  %v418_v20 = vld [vmem:[#allocation8 + $0x130] sm:$0xff] }
  0x7a   : > { %464 = vmatprep.subr.mxu0 %v391_v22  ;;  %v370_v16 = vmul.f32 0.25, %v350_v11  ;;  %v417_v21 = vld [vmem:[#allocation8 + $0x128] sm:$0xff]  ;;  %v416_v22 = vld [vmem:[#allocation8 + $0x120] sm:$0xff] }
  0x7b   : > { %465 = vmatpush1.msra.mxu0 %v390_v24  ;;  %v376_v24 = vmul.f32 0.25, %v368_v19  ;;  %v413_v27 = vld [vmem:[#allocation8 + $0x108] sm:$0xff]  ;;  %v412_v28 = vld [vmem:[#allocation8 + $0x100] sm:$0xff] }
  0x7c   : > { %466 = vmatprep.subr.mxu0 %v389_v25  ;;  %v374_v23 = vadd.f32 %v372_v17, %v370_v16  ;;  %v415_v25 = vld [vmem:[#allocation8 + $0x118] sm:$0xff] }
  0x7d   : > { %467 = vmatpush1.msra.mxu0 %v388_v26  ;;  %v414_v26 = vld [vmem:[#allocation8 + $0x110] sm:$0xff] }
  0x7e   : > { %468 = vmatprep.subr.mxu0 %v387_v29  ;;  %v378_v29 = vadd.f32 %v376_v24, %v374_v23 }
  0x7f   : > { %469 = vmatpush1.msra.mxu0 %v386_v34 }
  0x80   : > { %470 = vmatprep.subr.mxu0 %v385_v37 }
  0x81   : > { %471 = vmatpush1.msra.mxu0 %v384_v39 }
  0x82   : > { %472 = vmatprep.subr.mxu0 %v383_v42 }
  0x83   : > { %473 = vmatpush1.msra.mxu0 %v382_v44 }
  0x84   : > { %474 = vmatprep.subr.mxu0 %v381_v46 }
  0x85   : > { %475 = vmatpush1.msra.mxu0 %v380_v47 }
  0x86   : > { %476 = vmatprep.subr.mxu0 %v443_v49 }
  0x87   : > { %477 = vmatpush2.msra.mxu0 %v442_v50 }
  0x88   : > { %478 = vmatprep.subr.mxu0 %v441_v51 }
  0x89   : > { %479 = vmatpush2.msra.mxu0 %v440_v52 }
  0x8a   : > { %480 = vmatprep.subr.mxu0 %v439_v53 }
  0x8b   : > { %481 = vmatpush2.msra.mxu0 %v438_v54 }
  0x8c   : > { %482 = vmatprep.subr.mxu0 %v437_v55 }
  0x8d   : > { %483 = vmatpush2.msra.mxu0 %v436_v56 }
  0x8e   : > { %484 = vmatprep.subr.mxu0 %v435_v57 }
  0x8f   : > { %485 = vmatpush2.msra.mxu0 %v434_v58 }
  0x90   : > { %486 = vmatprep.subr.mxu0 %v433_v59 }
  0x91   : > { %487 = vmatpush2.msra.mxu0 %v432_v60 }
  0x92   : > { %488 = vmatprep.subr.mxu0 %v431_v61 }
  0x93   : > { %489 = vmatpush2.msra.mxu0 %v430_v63 }
  0x94   : > { %490 = vmatprep.subr.mxu0 %v429_v1 }
  0x95   : > { %491 = vmatpush2.msra.mxu0 %v428_v2 }
  0x96   : > { %492 = vmatprep.subr.mxu0 %v427_v3 }
  0x97   : > { %493 = vmatpush2.msra.mxu0 %v426_v6 }
  0x98   : > { %494 = vmatprep.subr.mxu0 %v425_v7 }
  0x99   : > { %495 = vmatpush2.msra.mxu0 %v424_v8 }
  0x9a   : > { %496 = vmatprep.subr.mxu0 %v423_v9 }
  0x9b   : > { %497 = vmatpush2.msra.mxu0 %v422_v13 }
  0x9c   : > { %498 = vmatprep.subr.mxu0 %v421_v14 }
  0x9d   : > { %499 = vmatpush2.msra.mxu0 %v420_v15 }
  0x9e   : > { %500 = vmatprep.subr.mxu0 %v419_v18 }
  0x9f   : > { %501 = vmatpush2.msra.mxu0 %v418_v20 }
  0xa0   : > { %502 = vmatprep.subr.mxu0 %v417_v21 }
  0xa1   : > { %503 = vmatpush2.msra.mxu0 %v416_v22 }
  0xa2   : > { %504 = vmatprep.subr.mxu0 %v415_v25 }
  0xa3   : > { %505 = vmatpush2.msra.mxu0 %v414_v26 }
  0xa4   : > { %506 = vmatprep.subr.mxu0 %v413_v27 }
  0xa5   : > { %507 = vmatpush2.msra.mxu0 %v412_v28 }
  0xa6   : > { %509 = vmatmul.mubr.f32.vlgmr.msra.gmra.mxu0 %v378_v29 }
 0x166   : > { %v510_v30 = vpop.f32.mrf.mxu0 }
 0x167   : > { %515 = vst [vmem:[%s327_s26] sm:$0xff] %v510_v30 }
 0x168   : > { %v512_v31 = vpop.f32.mrf.mxu0 }
 0x169   : > { %516 = vst [vmem:[%s327_s26 + $0x8] sm:$0xff] %v512_v31 }
 0x16a   : > { %914 = shalt.err (!%p911_p8)
}
 0x16b   : > { %s915_s2 = scalar_lea.hbm %s532_s27, 256  ;;  %s919_s28 = scalar_lea.hbm %s1270_s4, 512 }
 0x16c   : > { %p916_p5 = scmp.ne.s32.totalorder %s532_s27, %s915_s2  ;;  %p920_p10 = scmp.lt.s32.totalorder %s532_s27, %s1270_s4 }
 0x16d   : > { %p921_p7 = scmp.lt.s32.totalorder %s919_s28, %s915_s2 }
 0x16e   : > { %p917_p9 = pnand %p916_p5, %p1118_p12 }
 0x16f   : > { %p922_p13 = por %p921_p7, %p920_p10 }
 0x170   : > { %p918_p6 = pneg %p917_p9 }
 0x172   : > { %p923_p11 = pnand %p922_p13, %p918_p6 }
 0x174   : > { %926 = shalt.err (!%p923_p11)
}
 0x175   : > { %716 = dma.vmem_to_hbm [thread:$0]  (%p1118_p12), %s1221_s5, 256, %s532_s27, %s518_s13  }
 0x176 PF: > { %s546_s21 = sand.u32 1, %s969_s15   ;;  %p1298_p2 = scmp.ne.s32.totalorder %s1289_s6, 0 }
 0x177   : > { %p1299_p0 = scmp.ge.s32.totalorder %s989_s20, 2  ;;  %s547_s10 = scalar_lea.sflag [#allocation4], %s546_s21 }
 0x179   : > { %p733_p3 = pnand %p1299_p0, %p1298_p2 }
 0x17b   : > { %p734_p1 = pneg %p733_p3 }
 0x17d   : > { %964 = dma.done.wait (%p734_p1), %s547_s10, 256  }
 0x17e   : > { %966 = vsyncadd (%p734_p1), %s547_s10, 4294967040  ;;  %s24_s20 = sadd.s32 1, %s989_s20   ;;  %s1300_s0 = sld [smem:[#allocation15_spill]] }
 0x17f   : > { %p21_p4 = scmp.ge.s32.totalorder %s24_s20, 4   ;;  %s1301_s17 = sld [smem:[#allocation18_spill]] }
 0x180   : > { %s1302_s18 = sld [smem:[#allocation16_spill]]  ;;  %s1304_s15 = smov %s973_s16 }
 0x181   : > { %s1303_s19 = sld [smem:[#allocation17_spill]]  ;;  %23 = sbr.rel (!%p21_p4) target bundleno = 13 (0xd), region = 109 }
 0x184   : > { %s1305_s16 = smov %s1300_s0 }
 0x186   :  { %552 = vsyncpa [#allocation3], 1 }
 0x187   :  { %554 = vsyncpa [#allocation3 + $0x1], 1 }
 0x188   :  { %555 = vsyncpa [#allocation6], 1 }
 0x189   :  { %557 = vsyncpa [#allocation6 + $0x1], 1 }
 0x18a   :  { %558 = vsyncpa [#allocation9], 1 }
 0x18b   :  { %559 = vsyncpa [#allocation4], 1 }
 0x18c   :  { %561 = vsyncpa [#allocation4 + $0x1], 1 }

</bundles_post_ra>
